<compile_context>
chip_gen: v5e
topology: v5e:2x2
jax: 0.10.0
libtpu: 0.0.40
codegen_flags: <defaults>
</compile_context>

<pallas_src>
import functools

import jax
import jax.numpy as jnp
from jax import lax
from jax.experimental import pallas as pl
from jax.experimental.pallas import tpu as pltpu

EPS = 1e-5
NEG_SLOPE = 0.1


# --------------------------------------------------------------------------
# Shared: gather the kh*kw shifted [C_in, q] slices, stacked along sublanes.
# --------------------------------------------------------------------------
def _stacked_taps(x_ref, *, kh, kw, stride, w_pad, q):
    # x_ref: (1, C_in, ext) — zero-padded, spatially flattened image
    #        (lanes = flat padded spatial).  Returns [kh*kw*C_in, q].
    taps = []
    for idx in range(kh * kw):
        i, j = divmod(idx, kw)
        shift = i * w_pad + j
        if stride == 1:
            taps.append(x_ref[0, :, pl.ds(shift, q)])
        else:
            # TODO(synk): lane-strided gathers are slow; strided convs should
            # use 2D (ho, wo) block indexing / column compaction instead.
            taps.append(x_ref[0, :, pl.ds(shift, q, stride)])
    return jnp.concatenate(taps, axis=0)                     # [KK*C_in, q]


# --------------------------------------------------------------------------
# Kernel 1: stats-only pass — conv recomputed in pass 2, never written to HBM
# --------------------------------------------------------------------------
def _stats_kernel(x_ref, w_ref, sum_ref, sq_ref,
                  *, kh, kw, stride, w_pad, w_out, q):
    xs = _stacked_taps(x_ref, kh=kh, kw=kw, stride=stride, w_pad=w_pad, q=q)
    acc = jnp.dot(w_ref[...], xs, preferred_element_type=jnp.float32)  # [C_out, q]
    # in-kernel validity mask over padded-flat columns (wo < W_out)
    col = lax.broadcasted_iota(jnp.int32, (1, q), 1) % w_pad
    m = (col < w_out).astype(jnp.float32)
    masked = acc * m
    sum_ref[0] = jnp.sum(masked, axis=1, keepdims=True)        # [C_out, 1]
    sq_ref[0] = jnp.sum(masked * acc, axis=1, keepdims=True)   # [C_out, 1]


# --------------------------------------------------------------------------
# Kernel 2: conv recompute + fused BN-apply (precomputed scale/bias) + LeakyReLU
# --------------------------------------------------------------------------
def _conv_bn_lrelu_kernel(x_ref, w_ref, scale_ref, bias_ref, o_ref,
                          *, kh, kw, stride, w_pad, q):
    xs = _stacked_taps(x_ref, kh=kh, kw=kw, stride=stride, w_pad=w_pad, q=q)
    acc = jnp.dot(w_ref[...], xs, preferred_element_type=jnp.float32)  # [C_out, q]
    z = acc * scale_ref[0] + bias_ref[0]                               # [C_out, q]
    o_ref[0] = jnp.where(z >= 0, z, NEG_SLOPE * z)


# --------------------------------------------------------------------------
# Full CNNBlock forward
# --------------------------------------------------------------------------
@functools.partial(jax.jit, static_argnames=("stride", "padding"))
def cnn_block_forward(x_nchw, weight, gamma, beta, *, stride=1, padding=0):
    N, C_in, H, W = x_nchw.shape
    C_out, C_in_w, kh, kw = weight.shape
    assert C_in_w == C_in

    H_pad, W_pad = H + 2 * padding, W + 2 * padding
    H_out = (H_pad - kh) // stride + 1
    W_out = (W_pad - kw) // stride + 1
    Q = H_out * W_pad                   # padded-flat spatial (on lanes)
    KK = kh * kw

    # ---- input prep: NCHW zero-pad + contiguous (metadata-only) flatten ----
    x = x_nchw.astype(jnp.float32)
    xp = jnp.pad(x, ((0, 0), (0, 0), (padding, padding), (padding, padding)))
    x_flat = xp.reshape(N, C_in, H_pad * W_pad)
    max_idx = (kh - 1) * W_pad + (kw - 1) + (Q - 1) * stride
    ext = max(max_idx + 1, H_pad * W_pad)
    if ext > H_pad * W_pad:
        x_flat = jnp.pad(x_flat, ((0, 0), (0, 0), (0, ext - H_pad * W_pad)))

    # weight[co, ci, i, j] -> w_all[co, (i*kw+j)*C_in + ci]  (taps folded into K)
    w_all = weight.astype(jnp.float32).transpose(0, 2, 3, 1).reshape(C_out, KK * C_in)
    # TODO(synk): for realistic channel counts cast x_flat / w_all to bf16 for
    # the MXU (keep f32 accumulation); kept f32 here to hold the 2e-4 check.

    flops = 2 * N * Q * KK * C_in * C_out
    compiler_params = pltpu.CompilerParams(
        dimension_semantics=("parallel",),
        vmem_limit_bytes=32 * 1024 * 1024)

    # ---- pass 1: per-image BN partial stats (conv never hits HBM) ----
    # TODO(synk): for large images add an H_out tile axis (halo via manual DMA)
    # to bound VMEM on v7x (64 MiB) and deepen the pipeline.
    k1 = functools.partial(_stats_kernel, kh=kh, kw=kw, stride=stride,
                           w_pad=W_pad, w_out=W_out, q=Q)
    psum, psq = pl.pallas_call(
        k1,
        out_shape=(jax.ShapeDtypeStruct((N, C_out, 1), jnp.float32),
                   jax.ShapeDtypeStruct((N, C_out, 1), jnp.float32)),
        grid=(N,),
        in_specs=[
            pl.BlockSpec((1, C_in, ext), lambda n: (n, 0, 0)),
            pl.BlockSpec((C_out, KK * C_in), lambda n: (0, 0)),   # resident
        ],
        out_specs=(
            pl.BlockSpec((1, C_out, 1), lambda n: (n, 0, 0)),
            pl.BlockSpec((1, C_out, 1), lambda n: (n, 0, 0)),
        ),
        compiler_params=compiler_params,
        cost_estimate=pl.CostEstimate(
            flops=flops, transcendentals=0,
            bytes_accessed=4 * (x_flat.size + w_all.size + 2 * N * C_out)),
    )(x_flat, w_all)

    # ---- tiny stats combine + scale/bias precompute (XLA, (C,)-sized) ----
    count = N * H_out * W_out
    tot = jnp.sum(psum, axis=(0, 2))
    tot_sq = jnp.sum(psq, axis=(0, 2))
    mean = tot / count
    var = jnp.maximum(tot_sq / count - mean * mean, 0.0)   # biased var (BN norm)
    scale = gamma.astype(jnp.float32) * lax.rsqrt(var + EPS)
    bias = beta.astype(jnp.float32) - mean * scale

    # ---- pass 2: conv recompute + fused BN-apply + LeakyReLU (lane-dense out) ----
    k2 = functools.partial(_conv_bn_lrelu_kernel, kh=kh, kw=kw, stride=stride,
                           w_pad=W_pad, q=Q)
    out_flat = pl.pallas_call(
        k2,
        out_shape=jax.ShapeDtypeStruct((N, C_out, Q), jnp.float32),
        grid=(N,),
        in_specs=[
            pl.BlockSpec((1, C_in, ext), lambda n: (n, 0, 0)),
            pl.BlockSpec((C_out, KK * C_in), lambda n: (0, 0)),   # resident
            pl.BlockSpec((1, C_out, 1), lambda n: (0, 0, 0)),     # resident
            pl.BlockSpec((1, C_out, 1), lambda n: (0, 0, 0)),     # resident
        ],
        out_specs=pl.BlockSpec((1, C_out, Q), lambda n: (n, 0, 0)),
        compiler_params=compiler_params,
        cost_estimate=pl.CostEstimate(
            flops=flops, transcendentals=0,
            bytes_accessed=4 * (x_flat.size + w_all.size + 2 * C_out
                                + N * C_out * Q)),
    )(x_flat, w_all, scale.reshape(1, C_out, 1), bias.reshape(1, C_out, 1))

    # ---- contiguous reshape (metadata) + drop garbage columns; already NCHW ----
    # TODO(synk): the W_pad->W_out column drop could be fused into pass 2 with
    # per-row compact stores; left to a tiny XLA slice here.
    return out_flat.reshape(N, C_out, H_out, W_pad)[:, :, :, :W_out]


# --------------------------------------------------------------------------
# Pure-JAX reference (for correctness check)
# --------------------------------------------------------------------------
def reference_forward(x, weight, gamma, beta, *, stride, padding):
    conv = lax.conv_general_dilated(
        x, weight, window_strides=(stride, stride),
        padding=((padding, padding), (padding, padding)),
        dimension_numbers=("NCHW", "OIHW", "NCHW"))
    mean = conv.mean(axis=(0, 2, 3), keepdims=True)
    var = conv.var(axis=(0, 2, 3), keepdims=True)      # biased
    z = (conv - mean) / jnp.sqrt(var + EPS)
    z = z * gamma.reshape(1, -1, 1, 1) + beta.reshape(1, -1, 1, 1)
    return jnp.where(z >= 0, z, NEG_SLOPE * z)


if __name__ == "__main__":
    # CNNBlock(in_channels=4, out_channels=8, kernel_size=3, stride=1, padding=1)
    N, C_in, H, W = 2, 4, 16, 16
    C_out, k, stride, padding = 8, 3, 1, 1

    key = jax.random.PRNGKey(0)
    kx, kw_, kg, kb = jax.random.split(key, 4)
    x = jax.random.normal(kx, (N, C_in, H, W), dtype=jnp.float32)
    weight = jax.random.normal(kw_, (C_out, C_in, k, k), dtype=jnp.float32) * 0.1
    gamma = 1.0 + 0.1 * jax.random.normal(kg, (C_out,), dtype=jnp.float32)
    beta = 0.1 * jax.random.normal(kb, (C_out,), dtype=jnp.float32)

    out = cnn_block_forward(x, weight, gamma, beta, stride=stride, padding=padding)
    out = jax.block_until_ready(out)

    ref = reference_forward(x, weight, gamma, beta, stride=stride, padding=padding)
    assert out.shape == (N, C_out, H, W), out.shape
    max_err = float(jnp.max(jnp.abs(out - ref)))
    assert jnp.allclose(out, ref, rtol=2e-4, atol=2e-4), max_err

    print("KERNEL_OK")
</pallas_src>

<mosaic_0001>
module attributes {stable_mosaic.version = 11 : i64} {
  func.func @_stats_kernel(%arg0: i32, %arg1: memref<1x4x326xf32, #tpu.memory_space<vmem>>, %arg2: memref<8x36xf32, #tpu.memory_space<vmem>>, %arg3: memref<1x8x1xf32, #tpu.memory_space<vmem>>, %arg4: memref<1x8x1xf32, #tpu.memory_space<vmem>>) attributes {dimension_semantics = [#tpu.dimension_semantics<parallel>], iteration_bounds = array<i64: 2>, scalar_prefetch = 0 : i64, scratch_operands = 0 : i64, tpu.core_type = #tpu.core_type<tc>, window_params = [{transform_indices = @transform_0, window_bounds = array<i64: 1, 4, 326>}, {pipeline_mode = #tpu.pipeline_mode<synchronous>, transform_indices = @transform_1, window_bounds = array<i64: 8, 36>}, {transform_indices = @transform_2, window_bounds = array<i64: 1, 8, 1>}, {transform_indices = @transform_3, window_bounds = array<i64: 1, 8, 1>}]} {
    %c0 = arith.constant 0 : index
    %c0_0 = arith.constant 0 : index
    %c0_1 = arith.constant 0 : index
    %0 = vector.load %arg1[%c0, %c0_0, %c0_1] : memref<1x4x326xf32, #tpu.memory_space<vmem>>, vector<1x4x288xf32>
    %1 = vector.shape_cast %0 : vector<1x4x288xf32> to vector<4x288xf32>
    %c0_2 = arith.constant 0 : index
    %c0_3 = arith.constant 0 : index
    %c1 = arith.constant 1 : index
    %2 = vector.load %arg1[%c0_2, %c0_3, %c1] : memref<1x4x326xf32, #tpu.memory_space<vmem>>, vector<1x4x288xf32>
    %3 = vector.shape_cast %2 : vector<1x4x288xf32> to vector<4x288xf32>
    %c0_4 = arith.constant 0 : index
    %c0_5 = arith.constant 0 : index
    %c2 = arith.constant 2 : index
    %4 = vector.load %arg1[%c0_4, %c0_5, %c2] : memref<1x4x326xf32, #tpu.memory_space<vmem>>, vector<1x4x288xf32>
    %5 = vector.shape_cast %4 : vector<1x4x288xf32> to vector<4x288xf32>
    %c0_6 = arith.constant 0 : index
    %c0_7 = arith.constant 0 : index
    %c18 = arith.constant 18 : index
    %6 = vector.load %arg1[%c0_6, %c0_7, %c18] : memref<1x4x326xf32, #tpu.memory_space<vmem>>, vector<1x4x288xf32>
    %7 = vector.shape_cast %6 : vector<1x4x288xf32> to vector<4x288xf32>
    %c0_8 = arith.constant 0 : index
    %c0_9 = arith.constant 0 : index
    %c19 = arith.constant 19 : index
    %8 = vector.load %arg1[%c0_8, %c0_9, %c19] : memref<1x4x326xf32, #tpu.memory_space<vmem>>, vector<1x4x288xf32>
    %9 = vector.shape_cast %8 : vector<1x4x288xf32> to vector<4x288xf32>
    %c0_10 = arith.constant 0 : index
    %c0_11 = arith.constant 0 : index
    %c20 = arith.constant 20 : index
    %10 = vector.load %arg1[%c0_10, %c0_11, %c20] : memref<1x4x326xf32, #tpu.memory_space<vmem>>, vector<1x4x288xf32>
    %11 = vector.shape_cast %10 : vector<1x4x288xf32> to vector<4x288xf32>
    %c0_12 = arith.constant 0 : index
    %c0_13 = arith.constant 0 : index
    %c36 = arith.constant 36 : index
    %12 = vector.load %arg1[%c0_12, %c0_13, %c36] : memref<1x4x326xf32, #tpu.memory_space<vmem>>, vector<1x4x288xf32>
    %13 = vector.shape_cast %12 : vector<1x4x288xf32> to vector<4x288xf32>
    %c0_14 = arith.constant 0 : index
    %c0_15 = arith.constant 0 : index
    %c37 = arith.constant 37 : index
    %14 = vector.load %arg1[%c0_14, %c0_15, %c37] : memref<1x4x326xf32, #tpu.memory_space<vmem>>, vector<1x4x288xf32>
    %15 = vector.shape_cast %14 : vector<1x4x288xf32> to vector<4x288xf32>
    %c0_16 = arith.constant 0 : index
    %c0_17 = arith.constant 0 : index
    %c38 = arith.constant 38 : index
    %16 = vector.load %arg1[%c0_16, %c0_17, %c38] : memref<1x4x326xf32, #tpu.memory_space<vmem>>, vector<1x4x288xf32>
    %17 = vector.shape_cast %16 : vector<1x4x288xf32> to vector<4x288xf32>
    %18 = tpu.concatenate %1, %3, %5, %7, %9, %11, %13, %15, %17 in 0 : vector<4x288xf32>, vector<4x288xf32>, vector<4x288xf32>, vector<4x288xf32>, vector<4x288xf32>, vector<4x288xf32>, vector<4x288xf32>, vector<4x288xf32>, vector<4x288xf32> -> vector<36x288xf32>
    %c0_18 = arith.constant 0 : index
    %c0_19 = arith.constant 0 : index
    %19 = vector.load %arg2[%c0_18, %c0_19] : memref<8x36xf32, #tpu.memory_space<vmem>>, vector<8x36xf32>
    %cst = arith.constant dense<0.000000e+00> : vector<8x288xf32>
    %20 = tpu.matmul %19, %18, %cst {dimension_numbers = #tpu.dot_dimension_numbers<[1], [0], [0], [1], [0, 0, 1, 1], [], []>} : vector<8x36xf32>, vector<36x288xf32>, vector<8x288xf32> -> vector<8x288xf32>
    %21 = tpu.iota {dimensions = array<i32: 1>} : vector<1x288xi32>
    %c18_i32 = arith.constant 18 : i32
    %c0_i32 = arith.constant 0 : i32
    %22 = arith.cmpi eq, %c18_i32, %c0_i32 : i32
    %c1_i32 = arith.constant 1 : i32
    %23 = arith.select %22, %c1_i32, %c18_i32 : i32
    %24 = vector.broadcast %23 : i32 to vector<1x288xi32>
    %25 = arith.remsi %21, %24 : vector<1x288xi32>
    %c0_i32_20 = arith.constant 0 : i32
    %26 = vector.broadcast %c0_i32_20 : i32 to vector<1x288xi32>
    %27 = arith.cmpi ne, %25, %26 : vector<1x288xi32>
    %c0_i32_21 = arith.constant 0 : i32
    %28 = vector.broadcast %c0_i32_21 : i32 to vector<1x288xi32>
    %29 = arith.cmpi slt, %25, %28 : vector<1x288xi32>
    %c0_i32_22 = arith.constant 0 : i32
    %30 = arith.cmpi slt, %23, %c0_i32_22 : i32
    %31 = vector.broadcast %30 : i1 to vector<1x288xi1>
    %32 = vector.broadcast %31 : vector<1x288xi1> to vector<1x288xi1>
    %33 = arith.xori %29, %32 : vector<1x288xi1>
    %34 = arith.andi %33, %27 : vector<1x288xi1>
    %35 = vector.broadcast %23 : i32 to vector<1x288xi32>
    %36 = arith.addi %25, %35 : vector<1x288xi32>
    %37 = arith.select %34, %36, %25 : vector<1x288xi1>, vector<1x288xi32>
    %c16_i32 = arith.constant 16 : i32
    %38 = vector.broadcast %c16_i32 : i32 to vector<1x288xi32>
    %39 = arith.cmpi slt, %37, %38 : vector<1x288xi32>
    %40 = arith.extui %39 : vector<1x288xi1> to vector<1x288xi32>
    %41 = arith.sitofp %40 : vector<1x288xi32> to vector<1x288xf32>
    %42 = vector.broadcast %41 : vector<1x288xf32> to vector<8x288xf32>
    %43 = arith.mulf %20, %42 : vector<8x288xf32>
    %cst_23 = arith.constant dense<0.000000e+00> : vector<8xf32>
    %44 = vector.multi_reduction <add>, %43, %cst_23 [1] : vector<8x288xf32> to vector<8xf32>
    %45 = vector.shape_cast %44 : vector<8xf32> to vector<8x1xf32>
    %c0_24 = arith.constant 0 : index
    %c0_25 = arith.constant 0 : index
    %c0_26 = arith.constant 0 : index
    %46 = vector.load %arg3[%c0_24, %c0_25, %c0_26] : memref<1x8x1xf32, #tpu.memory_space<vmem>>, vector<1x8x1xf32>
    %47 = vector.shape_cast %46 : vector<1x8x1xf32> to vector<8x1xf32>
    %48 = vector.shape_cast %45 : vector<8x1xf32> to vector<1x8x1xf32>
    tpu.vector_store %arg3[%c0_24, %c0_25, %c0_26], %48 {strides = array<i32>} : memref<1x8x1xf32, #tpu.memory_space<vmem>>, vector<1x8x1xf32>,
    %49 = arith.mulf %43, %20 : vector<8x288xf32>
    %cst_27 = arith.constant dense<0.000000e+00> : vector<8xf32>
    %50 = vector.multi_reduction <add>, %49, %cst_27 [1] : vector<8x288xf32> to vector<8xf32>
    %51 = vector.shape_cast %50 : vector<8xf32> to vector<8x1xf32>
    %c0_28 = arith.constant 0 : index
    %c0_29 = arith.constant 0 : index
    %c0_30 = arith.constant 0 : index
    %52 = vector.load %arg4[%c0_28, %c0_29, %c0_30] : memref<1x8x1xf32, #tpu.memory_space<vmem>>, vector<1x8x1xf32>
    %53 = vector.shape_cast %52 : vector<1x8x1xf32> to vector<8x1xf32>
    %54 = vector.shape_cast %51 : vector<8x1xf32> to vector<1x8x1xf32>
    tpu.vector_store %arg4[%c0_28, %c0_29, %c0_30], %54 {strides = array<i32>} : memref<1x8x1xf32, #tpu.memory_space<vmem>>, vector<1x8x1xf32>,
    return
  }
  func.func @transform_0(%arg0: i32) -> (i32, i32, i32) {
    %c0_i32 = arith.constant 0 : i32
    %c0_i32_0 = arith.constant 0 : i32
    %c0_i32_1 = arith.constant 0 : i32
    return %arg0, %c0_i32, %c0_i32_0 : i32, i32, i32
  }
  func.func @transform_1(%arg0: i32) -> (i32, i32) {
    %c0_i32 = arith.constant 0 : i32
    %c0_i32_0 = arith.constant 0 : i32
    %c0_i32_1 = arith.constant 0 : i32
    return %c0_i32, %c0_i32_0 : i32, i32
  }
  func.func @transform_2(%arg0: i32) -> (i32, i32, i32) {
    %c0_i32 = arith.constant 0 : i32
    %c0_i32_0 = arith.constant 0 : i32
    %c0_i32_1 = arith.constant 0 : i32
    return %arg0, %c0_i32, %c0_i32_0 : i32, i32, i32
  }
  func.func @transform_3(%arg0: i32) -> (i32, i32, i32) {
    %c0_i32 = arith.constant 0 : i32
    %c0_i32_0 = arith.constant 0 : i32
    %c0_i32_1 = arith.constant 0 : i32
    return %arg0, %c0_i32, %c0_i32_0 : i32, i32, i32
  }
}

module attributes {stable_mosaic.version = 11 : i64} {
  func.func @_conv_bn_lrelu_kernel(%arg0: i32, %arg1: memref<1x4x326xf32, #tpu.memory_space<vmem>>, %arg2: memref<8x36xf32, #tpu.memory_space<vmem>>, %arg3: memref<1x8x1xf32, #tpu.memory_space<vmem>>, %arg4: memref<1x8x1xf32, #tpu.memory_space<vmem>>, %arg5: memref<1x8x288xf32, #tpu.memory_space<vmem>>) attributes {dimension_semantics = [#tpu.dimension_semantics<parallel>], iteration_bounds = array<i64: 2>, scalar_prefetch = 0 : i64, scratch_operands = 0 : i64, tpu.core_type = #tpu.core_type<tc>, window_params = [{transform_indices = @transform_0, window_bounds = array<i64: 1, 4, 326>}, {pipeline_mode = #tpu.pipeline_mode<synchronous>, transform_indices = @transform_1, window_bounds = array<i64: 8, 36>}, {pipeline_mode = #tpu.pipeline_mode<synchronous>, transform_indices = @transform_2, window_bounds = array<i64: 1, 8, 1>}, {pipeline_mode = #tpu.pipeline_mode<synchronous>, transform_indices = @transform_3, window_bounds = array<i64: 1, 8, 1>}, {transform_indices = @transform_4, window_bounds = array<i64: 1, 8, 288>}]} {
    %c0 = arith.constant 0 : index
    %c0_0 = arith.constant 0 : index
    %c0_1 = arith.constant 0 : index
    %0 = vector.load %arg1[%c0, %c0_0, %c0_1] : memref<1x4x326xf32, #tpu.memory_space<vmem>>, vector<1x4x288xf32>
    %1 = vector.shape_cast %0 : vector<1x4x288xf32> to vector<4x288xf32>
    %c0_2 = arith.constant 0 : index
    %c0_3 = arith.constant 0 : index
    %c1 = arith.constant 1 : index
    %2 = vector.load %arg1[%c0_2, %c0_3, %c1] : memref<1x4x326xf32, #tpu.memory_space<vmem>>, vector<1x4x288xf32>
    %3 = vector.shape_cast %2 : vector<1x4x288xf32> to vector<4x288xf32>
    %c0_4 = arith.constant 0 : index
    %c0_5 = arith.constant 0 : index
    %c2 = arith.constant 2 : index
    %4 = vector.load %arg1[%c0_4, %c0_5, %c2] : memref<1x4x326xf32, #tpu.memory_space<vmem>>, vector<1x4x288xf32>
    %5 = vector.shape_cast %4 : vector<1x4x288xf32> to vector<4x288xf32>
    %c0_6 = arith.constant 0 : index
    %c0_7 = arith.constant 0 : index
    %c18 = arith.constant 18 : index
    %6 = vector.load %arg1[%c0_6, %c0_7, %c18] : memref<1x4x326xf32, #tpu.memory_space<vmem>>, vector<1x4x288xf32>
    %7 = vector.shape_cast %6 : vector<1x4x288xf32> to vector<4x288xf32>
    %c0_8 = arith.constant 0 : index
    %c0_9 = arith.constant 0 : index
    %c19 = arith.constant 19 : index
    %8 = vector.load %arg1[%c0_8, %c0_9, %c19] : memref<1x4x326xf32, #tpu.memory_space<vmem>>, vector<1x4x288xf32>
    %9 = vector.shape_cast %8 : vector<1x4x288xf32> to vector<4x288xf32>
    %c0_10 = arith.constant 0 : index
    %c0_11 = arith.constant 0 : index
    %c20 = arith.constant 20 : index
    %10 = vector.load %arg1[%c0_10, %c0_11, %c20] : memref<1x4x326xf32, #tpu.memory_space<vmem>>, vector<1x4x288xf32>
    %11 = vector.shape_cast %10 : vector<1x4x288xf32> to vector<4x288xf32>
    %c0_12 = arith.constant 0 : index
    %c0_13 = arith.constant 0 : index
    %c36 = arith.constant 36 : index
    %12 = vector.load %arg1[%c0_12, %c0_13, %c36] : memref<1x4x326xf32, #tpu.memory_space<vmem>>, vector<1x4x288xf32>
    %13 = vector.shape_cast %12 : vector<1x4x288xf32> to vector<4x288xf32>
    %c0_14 = arith.constant 0 : index
    %c0_15 = arith.constant 0 : index
    %c37 = arith.constant 37 : index
    %14 = vector.load %arg1[%c0_14, %c0_15, %c37] : memref<1x4x326xf32, #tpu.memory_space<vmem>>, vector<1x4x288xf32>
    %15 = vector.shape_cast %14 : vector<1x4x288xf32> to vector<4x288xf32>
    %c0_16 = arith.constant 0 : index
    %c0_17 = arith.constant 0 : index
    %c38 = arith.constant 38 : index
    %16 = vector.load %arg1[%c0_16, %c0_17, %c38] : memref<1x4x326xf32, #tpu.memory_space<vmem>>, vector<1x4x288xf32>
    %17 = vector.shape_cast %16 : vector<1x4x288xf32> to vector<4x288xf32>
    %18 = tpu.concatenate %1, %3, %5, %7, %9, %11, %13, %15, %17 in 0 : vector<4x288xf32>, vector<4x288xf32>, vector<4x288xf32>, vector<4x288xf32>, vector<4x288xf32>, vector<4x288xf32>, vector<4x288xf32>, vector<4x288xf32>, vector<4x288xf32> -> vector<36x288xf32>
    %c0_18 = arith.constant 0 : index
    %c0_19 = arith.constant 0 : index
    %19 = vector.load %arg2[%c0_18, %c0_19] : memref<8x36xf32, #tpu.memory_space<vmem>>, vector<8x36xf32>
    %cst = arith.constant dense<0.000000e+00> : vector<8x288xf32>
    %20 = tpu.matmul %19, %18, %cst {dimension_numbers = #tpu.dot_dimension_numbers<[1], [0], [0], [1], [0, 0, 1, 1], [], []>} : vector<8x36xf32>, vector<36x288xf32>, vector<8x288xf32> -> vector<8x288xf32>
    %c0_20 = arith.constant 0 : index
    %c0_21 = arith.constant 0 : index
    %c0_22 = arith.constant 0 : index
    %21 = vector.load %arg3[%c0_20, %c0_21, %c0_22] : memref<1x8x1xf32, #tpu.memory_space<vmem>>, vector<1x8x1xf32>
    %22 = vector.shape_cast %21 : vector<1x8x1xf32> to vector<8x1xf32>
    %23 = vector.broadcast %22 : vector<8x1xf32> to vector<8x288xf32>
    %24 = arith.mulf %20, %23 : vector<8x288xf32>
    %c0_23 = arith.constant 0 : index
    %c0_24 = arith.constant 0 : index
    %c0_25 = arith.constant 0 : index
    %25 = vector.load %arg4[%c0_23, %c0_24, %c0_25] : memref<1x8x1xf32, #tpu.memory_space<vmem>>, vector<1x8x1xf32>
    %26 = vector.shape_cast %25 : vector<1x8x1xf32> to vector<8x1xf32>
    %27 = vector.broadcast %26 : vector<8x1xf32> to vector<8x288xf32>
    %28 = arith.addf %24, %27 : vector<8x288xf32>
    %cst_26 = arith.constant 0.000000e+00 : f32
    %29 = vector.broadcast %cst_26 : f32 to vector<8x288xf32>
    %30 = arith.cmpf oge, %28, %29 : vector<8x288xf32>
    %cst_27 = arith.constant 1.000000e-01 : f32
    %31 = vector.broadcast %cst_27 : f32 to vector<8x288xf32>
    %32 = arith.mulf %31, %28 : vector<8x288xf32>
    %33 = arith.select %30, %28, %32 : vector<8x288xi1>, vector<8x288xf32>
    %c0_28 = arith.constant 0 : index
    %c0_29 = arith.constant 0 : index
    %c0_30 = arith.constant 0 : index
    %34 = vector.load %arg5[%c0_28, %c0_29, %c0_30] : memref<1x8x288xf32, #tpu.memory_space<vmem>>, vector<1x8x288xf32>
    %35 = vector.shape_cast %34 : vector<1x8x288xf32> to vector<8x288xf32>
    %36 = vector.shape_cast %33 : vector<8x288xf32> to vector<1x8x288xf32>
    tpu.vector_store %arg5[%c0_28, %c0_29, %c0_30], %36 {strides = array<i32>} : memref<1x8x288xf32, #tpu.memory_space<vmem>>, vector<1x8x288xf32>,
    return
  }
  func.func @transform_0(%arg0: i32) -> (i32, i32, i32) {
    %c0_i32 = arith.constant 0 : i32
    %c0_i32_0 = arith.constant 0 : i32
    %c0_i32_1 = arith.constant 0 : i32
    return %arg0, %c0_i32, %c0_i32_0 : i32, i32, i32
  }
  func.func @transform_1(%arg0: i32) -> (i32, i32) {
    %c0_i32 = arith.constant 0 : i32
    %c0_i32_0 = arith.constant 0 : i32
    %c0_i32_1 = arith.constant 0 : i32
    return %c0_i32, %c0_i32_0 : i32, i32
  }
  func.func @transform_2(%arg0: i32) -> (i32, i32, i32) {
    %c0_i32 = arith.constant 0 : i32
    %c0_i32_0 = arith.constant 0 : i32
    %c0_i32_1 = arith.constant 0 : i32
    %c0_i32_2 = arith.constant 0 : i32
    return %c0_i32, %c0_i32_0, %c0_i32_1 : i32, i32, i32
  }
  func.func @transform_3(%arg0: i32) -> (i32, i32, i32) {
    %c0_i32 = arith.constant 0 : i32
    %c0_i32_0 = arith.constant 0 : i32
    %c0_i32_1 = arith.constant 0 : i32
    %c0_i32_2 = arith.constant 0 : i32
    return %c0_i32, %c0_i32_0, %c0_i32_1 : i32, i32, i32
  }
  func.func @transform_4(%arg0: i32) -> (i32, i32, i32) {
    %c0_i32 = arith.constant 0 : i32
    %c0_i32_0 = arith.constant 0 : i32
    %c0_i32_1 = arith.constant 0 : i32
    return %arg0, %c0_i32, %c0_i32_0 : i32, i32, i32
  }
}

</mosaic_0001>

<bundles_post_ra>
// kernel: cnn_block_forward.2
= control target key start
LH: loop header
LB: loop body
LE: loop exit
PB: predicated region body
PF: predicated region fallthrough
CT: control target
= control target key end

     0   :  { %s752_s12 = smov 0   ;;  %s854_s0 = inlined_call_operand.vmem [shape: f32[2,4,326], index: 0, kind: input, shape index: {}]   ;;  %s855_s1 = inlined_call_operand.vmem [shape: f32[8,36], index: 1, kind: input, shape index: {}]   ;;  %s856_s2 = inlined_call_operand.vmem [shape: f32[2,8,1], index: 2, kind: output, shape index: {0}]   ;;  %s857_s3 = inlined_call_operand.vmem [shape: f32[2,8,1], index: 3, kind: output, shape index: {1}]  }
   0x1 LB: > { %s641_s13 = sadd.s32 4294967295, %s720_s12   ;;  %p645_p0 = scmp.ge.s32.totalorder %s720_s12, 1  ;;  %s720_s12 = sphi %s752_s12, %s14_s12  }
   0x2   : > { %p140_p1 = scmp.lt.s32.totalorder %s720_s12, 3 }
   0x4   : > { %p141_p2 = pnand %p645_p0, %p140_p1 }
   0x5   : > { %p167_p3 = scmp.lt.s32.totalorder (!%p141_p2), %s641_s13, 1  ;;  %s722_s18 = smov (!%p141_p2), 127  }
   0x6   : > { %144 = sbr.rel (%p141_p2) target bundleno = 478 (0x1de), region = 28  ;;  %s723_s19 = smov (!%p141_p2), 126  }
   0x7   : > { %s724_s20 = smov (!%p141_p2), 110   ;;  %s725_s21 = smov (!%p141_p2), 109  }
   0x8   : > { %s726_s22 = smov (!%p141_p2), 108   ;;  %s727_s23 = smov (!%p141_p2), 92  }
   0x9   : > { %s728_s24 = smov (!%p141_p2), 91   ;;  %s729_s25 = smov (!%p141_p2), 90  }
   0xb   : > { %s859_s13 = smov (!%p167_p3, %s641_s13), 1  ;;  %vm338_vm0 = vcmask 1043456   ;;  %vm261_vm1 = vcmask 891904   ;;  %vm317_vm2 = vcmask 744448   ;;  %vm280_vm3 = vcmask 883712  }
   0xc   : > { %s660_s14 = smul.u32 12, %s859_s13  ;;  %vm335_vm4 = vcmask 736256   ;;  %vm298_vm5 = vcmask 752640   ;;  %vm352_vm6 = vcmask 293888   ;;  %vm224_vm7 = vcmask 1031168   ;;  %s647_s28 = sshll.u32 %s859_s13, 3 }
   0xd   : > { %vm206_vm8 = vcmask 1039360   ;;  %vm243_vm9 = vcmask 900096   ;;  %s175_s4 = scalar_lea.vmem %s856_s2, %s647_s28  ;;  %s179_s7 = scalar_lea.vmem %s857_s3, %s647_s28 }
   0xe   : > { %s171_s17 = scalar_lea.vmem %s854_s0, %s660_s14 }
   0xf   : > { %v180_v0 = vld [vmem:[%s171_s17] sm:$0xff]  ;;  %v181_v1 = vld [vmem:[%s171_s17 + $0x8] sm:$0xf] }
  0x10   : > { %184 = vst [vmem:[#allocation1] ss:$2 sm:$0xff] %v180_v0 }
  0x11   : > { %186 = vst [vmem:[#allocation1 + $0x10] ss:$2 sm:$0xff] %v181_v1 }
  0x17   : > { %v766_v2 = vld.sshfl [vmem:[#allocation1] sm:$0xff pattern:$0x75316420]  ;;  %v768_v3 = vld.sshfl [vmem:[#allocation1 + $0x8] sm:$0xff pattern:$0x75316420] }
  0x18   : > { %v770_v4 = vld.sshfl [vmem:[#allocation1 + $0x10] sm:$0xff pattern:$0x75316420]  ;;  %194 = vst [vmem:[#allocation1 + $0x1] ss:$2 sm:$0xff] %v180_v0 }
  0x19   : > { %196 = vst [vmem:[#allocation1 + $0x11] ss:$2 sm:$0xff] %v181_v1 }
  0x1f   : > { %v197_v5 = vld.sshfl [vmem:[#allocation1] sm:$0xff pattern:$0x75316420]  ;;  %v772_v6 = vld.sshfl [vmem:[#allocation1 + $0x8] sm:$0xff pattern:$0x75316420] }
  0x20   : > { %v199_v7 = vld.sshfl [vmem:[#allocation1 + $0x10] sm:$0xff pattern:$0x75316420]  ;;  %212 = vst [vmem:[#allocation1] ss:$2 sm:$0xff] %v180_v0 }
  0x21   : > { %214 = vst [vmem:[#allocation1 + $0x10] ss:$2 sm:$0xff] %v181_v1  ;;  %v679_v8 = vpack.i.bf16 %v197_v5, %v199_v7  ;;  %v351_v7 = vld [vmem:[%s855_s1] sm:$0xff] }
  0x23   : > { %680 = vrot.lane.b32.xlu2 %v679_v8, %s722_s18 }
  0x27   : > { %v215_v9 = vld.sshfl [vmem:[#allocation1] sm:$0xff pattern:$0x75316420]  ;;  %v216_v10 = vld.sshfl [vmem:[#allocation1 + $0x8] sm:$0xff pattern:$0x75316420] }
  0x28   : > { %v217_v11 = vld.sshfl [vmem:[#allocation1 + $0x10] sm:$0xff pattern:$0x75316420]  ;;  %231 = vst [vmem:[#allocation1 + $0x1] ss:$2 sm:$0xff] %v180_v0 }
  0x29   : > { %233 = vst [vmem:[#allocation1 + $0x11] ss:$2 sm:$0xff] %v181_v1  ;;  %v684_v12 = vpack.i.bf16 %v215_v9, %v217_v11 }
  0x2b   : > { %685 = vrot.lane.b32.xlu1 %v684_v12, %s723_s19 }
  0x2f   : > { %v234_v13 = vld.sshfl [vmem:[#allocation1] sm:$0xff pattern:$0x75316420]  ;;  %v235_v14 = vld.sshfl [vmem:[#allocation1 + $0x8] sm:$0xff pattern:$0x75316420] }
  0x30   : > { %v236_v15 = vld.sshfl [vmem:[#allocation1 + $0x10] sm:$0xff pattern:$0x75316420]  ;;  %249 = vst [vmem:[#allocation1] ss:$2 sm:$0xff] %v180_v0 }
  0x31   : > { %251 = vst [vmem:[#allocation1 + $0x10] ss:$2 sm:$0xff] %v181_v1  ;;  %v689_v16 = vpack.i.bf16 %v234_v13, %v236_v15 }
  0x33   : > { %690 = vrot.lane.b32.xlu2 %v689_v16, %s724_s20 }
  0x37   : > { %v252_v17 = vld.sshfl [vmem:[#allocation1] sm:$0xff pattern:$0x75316420]  ;;  %v253_v18 = vld.sshfl [vmem:[#allocation1 + $0x8] sm:$0xff pattern:$0x75316420] }
  0x38   : > { %v254_v19 = vld.sshfl [vmem:[#allocation1 + $0x10] sm:$0xff pattern:$0x75316420]  ;;  %257 = vrot.lane.b32.xlu0 %v253_v18, %s725_s21  ;;  %268 = vst [vmem:[#allocation1 + $0x1] ss:$2 sm:$0xff] %v180_v0 }
  0x39   : > { %270 = vst [vmem:[#allocation1 + $0x11] ss:$2 sm:$0xff] %v181_v1  ;;  %v694_v20 = vpack.i.bf16 %v252_v17, %v254_v19 }
  0x3b   : > { %695 = vrot.lane.b32.xlu1 %v694_v20, %s725_s21 }
  0x3f   : > { %v272_v21 = vld.sshfl [vmem:[#allocation1 + $0x8] sm:$0xff pattern:$0x75316420]  ;;  %v271_v22 = vld.sshfl [vmem:[#allocation1] sm:$0xff pattern:$0x75316420] }
  0x40   : > { %v273_v23 = vld.sshfl [vmem:[#allocation1 + $0x10] sm:$0xff pattern:$0x75316420]  ;;  %286 = vst [vmem:[#allocation1] ss:$2 sm:$0xff] %v180_v0 }
  0x41   : > { %288 = vst [vmem:[#allocation1 + $0x10] ss:$2 sm:$0xff] %v181_v1  ;;  %v699_v24 = vpack.i.bf16 %v271_v22, %v273_v23 }
  0x43   : > { %276 = vrot.lane.b32.xlu1 %v272_v21, %s726_s22  ;;  %700 = vrot.lane.b32.xlu2 %v699_v24, %s726_s22 }
  0x47   : > { %v289_v25 = vld.sshfl [vmem:[#allocation1] sm:$0xff pattern:$0x75316420]  ;;  %v290_v26 = vld.sshfl [vmem:[#allocation1 + $0x8] sm:$0xff pattern:$0x75316420] }
  0x48   : > { %v291_v27 = vld.sshfl [vmem:[#allocation1 + $0x10] sm:$0xff pattern:$0x75316420]  ;;  %305 = vst [vmem:[#allocation1 + $0x1] ss:$2 sm:$0xff] %v180_v0 }
  0x49   : > { %307 = vst [vmem:[#allocation1 + $0x11] ss:$2 sm:$0xff] %v181_v1  ;;  %v704_v28 = vpack.i.bf16 %v289_v25, %v291_v27 }
  0x4b   : > { %705 = vrot.lane.b32.xlu0 %v704_v28, %s727_s23 }
  0x4f   : > { %v308_v29 = vld.sshfl [vmem:[#allocation1] sm:$0xff pattern:$0x75316420]  ;;  %v309_v30 = vld.sshfl [vmem:[#allocation1 + $0x8] sm:$0xff pattern:$0x75316420] }
  0x50   : > { %v310_v31 = vld.sshfl [vmem:[#allocation1 + $0x10] sm:$0xff pattern:$0x75316420]  ;;  %323 = vst [vmem:[#allocation1] ss:$2 sm:$0xff] %v180_v0 }
  0x51   : > { %325 = vst [vmem:[#allocation1 + $0x10] ss:$2 sm:$0xff] %v181_v1  ;;  %v709_v32 = vpack.i.bf16 %v308_v29, %v310_v31 }
  0x53   : > { %294 = vrot.lane.b32.xlu0 %v290_v26, %s727_s23  ;;  %710 = vrot.lane.b32.xlu1 %v709_v32, %s728_s24 }
  0x57   : > { %v326_v33 = vld.sshfl [vmem:[#allocation1] sm:$0xff pattern:$0x75316420]  ;;  %v327_v35 = vld.sshfl [vmem:[#allocation1 + $0x8] sm:$0xff pattern:$0x75316420] }
  0x58   : > { %329 = vrot.lane.b32.xlu2 %v326_v33, %s729_s25  ;;  %v328_v34 = vld.sshfl [vmem:[#allocation1 + $0x10] sm:$0xff pattern:$0x75316420] }
  0x5b   : > { %333 = vrot.lane.b32.xlu0 %v328_v34, %s729_s25  ;;  %313 = vrot.lane.b32.xlu1 %v309_v30, %s728_s24  ;;  %v422_v34 = vlaneseq }
  0x60   : > { %220 = vrot.lane.b32.xlu2 %v216_v10, %s723_s19 }
  0x63   : > { %202 = vrot.lane.b32.xlu1 %v772_v6, %s722_s18  ;;  %331 = vrot.lane.b32.xlu0 %v327_v35, %s729_s25  ;;  %v827_v35 = vand.u32 127, %v422_v34 }
  0x6b   : > { %239 = vrot.lane.b32.xlu0 %v235_v14, %s724_s20 }
  0x7d   : > { %v783_v37 = vpop.permute.xlu2 %680 }
  0x7e   : > { %v682_v54 = vunpack.i.l.bf16 %v783_v37  ;;  %v683_v21 = vunpack.i.h.bf16 %v783_v37  ;;  %v833_v37 = vadd.s32 128, %v827_v35 }
  0x80   : > { %v341_v63 = vsel %vm338_vm0, %v770_v4, %v682_v54 }
  0x8d   : > { %v785_v40 = vpop.permute.xlu2 %690 }
  0x8e   : > { %v692_v49 = vunpack.i.l.bf16 %v785_v40  ;;  %v693_v22 = vunpack.i.h.bf16 %v785_v40 }
  0x9d   : > { %v781_v36 = vpop.permute.xlu1 %685  ;;  %v701_v44 = vpop.permute.xlu2 %700 }
  0x9e   : > { %v687_v50 = vunpack.i.l.bf16 %v781_v36  ;;  %v702_v51 = vunpack.i.l.bf16 %v701_v44  ;;  %v703_v60 = vunpack.i.h.bf16 %v701_v44  ;;  %v688_v19 = vunpack.i.h.bf16 %v781_v36 }
  0x9f   : > { %v830_v36 = vadd.s32 256, %v827_v35 }
  0xa0   : > { %v344_v61 = vsel %vm338_vm0, %v687_v50, %v692_v49 }
  0xaa   : > { %v258_v38 = vpop.permute.xlu0 %257 }
  0xad   : > { %v696_v39 = vpop.permute.xlu1 %695 }
  0xae   : > { %v697_v52 = vunpack.i.l.bf16 %v696_v39  ;;  %v698_v55 = vunpack.i.h.bf16 %v696_v39  ;;  %v488_v39 = vshrl.u32 %v830_v36, 16 }
  0xb0   : > { %v347_v59 = vsel %vm338_vm0, %v697_v52, %v702_v51  ;;  %v262_v62 = vsel %vm261_vm1, %v698_v55, %v258_v38  ;;  %v263_v8 = vsel %vm261_vm1, %v258_v38, %v697_v52  ;;  %v429_v38 = vand.u32 65535, %v827_v35 }
  0xb1   : > { %v492_v44 = vmul.u32 14564, %v488_v39 }
  0xb2   : > { %v330_v56 = vpop.permute.xlu2 %329 }
  0xb3   : > { %v496_v52 = vshll.u32 %v492_v44, 16 }
  0xb5   : > { %v277_v42 = vpop.permute.xlu1 %276 }
  0xb6   : > { %v281_v9 = vsel %vm280_vm3, %v703_v60, %v277_v42  ;;  %v282_v12 = vsel %vm280_vm3, %v277_v42, %v702_v51  ;;  %v433_v42 = vmul.u32 58254, %v429_v38 }
  0xb7   : > { %v345_v17 = vsel %vm338_vm0, %v262_v62, %v281_v9  ;;  %v346_v18 = vsel %vm338_vm0, %v263_v8, %v282_v12 }
  0xba   : > { %v221_v16 = vpop.permute.xlu2 %220 }
  0xbb   : > { %v225_v23 = vsel %vm224_vm7, %v688_v19, %v221_v16  ;;  %v226_v24 = vsel %vm224_vm7, %v221_v16, %v687_v50  ;;  %v436_v50 = vshll.u32 %v433_v42, 16 }
  0xbd   : > { %v706_v41 = vpop.permute.xlu0 %705 }
  0xbe   : > { %v707_v47 = vunpack.i.l.bf16 %v706_v41  ;;  %v708_v0 = vunpack.i.h.bf16 %v706_v41  ;;  %v430_v41 = vshrl.u32 %v827_v35, 16 }
  0xc5   : > { %v295_v43 = vpop.permute.xlu0 %294  ;;  %v711_v45 = vpop.permute.xlu1 %710 }
  0xc6   : > { %v712_v46 = vunpack.i.l.bf16 %v711_v45  ;;  %v713_v57 = vunpack.i.h.bf16 %v711_v45  ;;  %v299_v4 = vsel %vm298_vm5, %v708_v0, %v295_v43  ;;  %v300_v13 = vsel %vm298_vm5, %v295_v43, %v707_v47 }
  0xc8   : > { %v350_v53 = vsel %vm338_vm0, %v707_v47, %v712_v46 }
  0xcd   : > { %v334_v48 = vpop.permute.xlu0 %333  ;;  %v314_v58 = vpop.permute.xlu1 %313 }
  0xce   : > { %653 = vmatpush.msk.msra.mxu2 %vm338_vm0, %v334_v48  ;;  %v318_v1 = vsel %vm317_vm2, %v713_v57, %v314_v58  ;;  %v319_v5 = vsel %vm317_vm2, %v314_v58, %v712_v46  ;;  %v459_v46 = vshrl.u32 %v833_v37, 16 }
  0xcf   : > { %v348_v14 = vsel %vm338_vm0, %v299_v4, %v318_v1  ;;  %v349_v15 = vsel %vm338_vm0, %v300_v13, %v319_v5  ;;  %v437_v13 = vshrl.u32 %v433_v42, 16 }
  0xd0   : > { %414 = vmatpush.msra.mxu2 %v350_v53  ;;  %v464_v0 = vmul.u32 58254, %v459_v46 }
  0xd2   : > { %415 = vmatpush.msra.mxu2 %v347_v59  ;;  %v730_v59 = vmov 0  }
  0xd4   : > { %416 = vmatpush.msra.mxu2 %v344_v61  ;;  %v435_v61 = vmul.u32 58254, %v430_v41 }
  0xd5   : > { %v332_v6 = vpop.permute.xlu0 %331  ;;  %v203_v20 = vpop.permute.xlu1 %202 }
  0xd6   : > { %417 = vmatpush.msra.mxu2 %v341_v63  ;;  %v336_v10 = vsel %vm335_vm4, %v330_v56, %v332_v6  ;;  %v337_v11 = vsel %vm335_vm4, %v332_v6, %v334_v48  ;;  %v207_v26 = vsel %vm206_vm8, %v683_v21, %v203_v20  ;;  %v208_v27 = vsel %vm206_vm8, %v203_v20, %v682_v54 }
  0xd7   : > { %649 = vmatpush.msk.msra.mxu0 %vm338_vm0, %v336_v10  ;;  %651 = vmatpush.msk.msra.mxu1 %vm338_vm0, %v337_v11  ;;  %v339_v32 = vsel %vm338_vm0, %v766_v2, %v207_v26  ;;  %v340_v33 = vsel %vm338_vm0, %v768_v3, %v208_v27  ;;  %v487_v2 = vand.u32 65535, %v830_v36  ;;  %v458_v3 = vand.u32 65535, %v833_v37 }
  0xd8   : > { %654 = vmatmul.msk.f32.vlgmr.msra.gmra.mxu2 %vm352_vm6, %v351_v7  ;;  %v432_v48 = vmul.u32 14564, %v429_v38  ;;  %v463_v54 = vmul.u32 14564, %v459_v46  ;;  %v493_v56 = vmul.u32 58254, %v488_v39 }
  0xd9   : > { %374 = vmatpush.msra.mxu0 %v348_v14  ;;  %394 = vmatpush.msra.mxu1 %v349_v15  ;;  %v491_v40 = vmul.u32 58254, %v487_v2  ;;  %v490_v43 = vmul.u32 14564, %v487_v2  ;;  %v462_v47 = vmul.u32 58254, %v458_v3  ;;  %v461_v51 = vmul.u32 14564, %v458_v3 }
  0xda   : > { %vm440_vm11 = vc.u32 %v432_v48, %v436_v50  ;;  %v442_v58 = vadd.s32 %v436_v50, %v432_v48  ;;  %v467_v62 = vshll.u32 %v463_v54, 16  ;;  %v468_v21 = vshrl.u32 %v463_v54, 16 }
  0xdb   : > { %375 = vmatpush.msra.mxu0 %v345_v17  ;;  %395 = vmatpush.msra.mxu1 %v346_v18  ;;  %v494_v45 = vshll.u32 %v491_v40, 16  ;;  %v465_v55 = vshll.u32 %v462_v47, 16  ;;  %v441_v63 = vsel %vm440_vm11, 1, %v730_v59  ;;  %v495_v11 = vshrl.u32 %v491_v40, 16 }
  0xdc   : > { %v443_v8 = vadd.s32 %v441_v63, %v435_v61  ;;  %v466_v15 = vshrl.u32 %v462_v47, 16  ;;  %v497_v17 = vshrl.u32 %v492_v44, 16 }
  0xdd   : > { %v240_v25 = vpop.permute.xlu0 %239  ;;  %vm498_vm10 = vc.u32 %v490_v43, %v494_v45  ;;  %v500_v53 = vadd.s32 %v494_v45, %v490_v43  ;;  %vm469_vm13 = vc.u32 %v461_v51, %v465_v55  ;;  %v471_v6 = vadd.s32 %v465_v55, %v461_v51 }
  0xde   : > { %v244_v28 = vsel %vm243_vm9, %v693_v22, %v240_v25  ;;  %v245_v29 = vsel %vm243_vm9, %v240_v25, %v692_v49  ;;  %v434_v49 = vmul.u32 14564, %v430_v41  ;;  %v499_v60 = vsel %vm498_vm10, 1, %v730_v59 }
  0xdf   : > { %v342_v30 = vsel %vm338_vm0, %v225_v23, %v244_v28  ;;  %v343_v31 = vsel %vm338_vm0, %v226_v24, %v245_v29  ;;  %vm502_vm12 = vc.u32 %v500_v53, %v496_v52  ;;  %v501_v1 = vadd.s32 %v499_v60, %v493_v56 }
  0xe0   : > { %376 = vmatpush.msra.mxu0 %v342_v30  ;;  %396 = vmatpush.msra.mxu1 %v343_v31  ;;  %v438_v57 = vshll.u32 %v434_v49, 16  ;;  %v470_v5 = vsel %vm469_vm13, 1, %v730_v59  ;;  %vm473_vm15 = vc.u32 %v471_v6, %v467_v62  ;;  %v439_v19 = vshrl.u32 %v434_v49, 16 }
  0xe1   : > { %v472_v10 = vadd.s32 %v470_v5, %v464_v0  ;;  %v474_v4 = vsel %vm473_vm15, 1, %v730_v59  ;;  %vm546_vm13 = vcmask 7168  }
  0xe2   : > { %377 = vmatpush.msra.mxu0 %v339_v32  ;;  %397 = vmatpush.msra.mxu1 %v340_v33  ;;  %vm444_vm14 = vc.u32 %v442_v58, %v438_v57 }
  0xe3   : > { %650 = vmatmul.msk.f32.vlgmr.msra.gmra.mxu0 %vm352_vm6, %v351_v7  ;;  %652 = vmatmul.msk.f32.vlgmr.msra.gmra.mxu1 %vm352_vm6, %v351_v7  ;;  %v503_v7 = vsel %vm502_vm12, 1, %v730_v59  ;;  %v445_v9 = vsel %vm444_vm14, 1, %v730_v59  ;;  %v476_v16 = vadd.s32 %v474_v4, %v472_v10  ;;  %vm541_vm12 = vcmask 261120  }
  0xe4   : > { %v505_v12 = vadd.s32 %v503_v7, %v501_v1  ;;  %v447_v14 = vadd.s32 %v445_v9, %v443_v8 }
  0xe5   : > { %v477_v22 = vadd.s32 %v476_v16, %v466_v15 }
  0xe6   : > { %v506_v18 = vadd.s32 %v505_v12, %v495_v11  ;;  %v448_v20 = vadd.s32 %v447_v14, %v437_v13 }
  0xe7   : > { %v478_v25 = vadd.s32 %v477_v22, %v468_v21 }
  0xe8   : > { %v507_v23 = vadd.s32 %v506_v18, %v497_v17  ;;  %v449_v24 = vadd.s32 %v448_v20, %v439_v19 }
  0xe9   : > { %v479_v28 = vshrl.u32 %v478_v25, 4 }
  0xea   : > { %v508_v26 = vshrl.u32 %v507_v23, 4  ;;  %v450_v27 = vshrl.u32 %v449_v24, 4 }
  0xeb   : > { %v480_v31 = vmul.u32 18, %v479_v28 }
  0xec   : > { %v509_v29 = vmul.u32 18, %v508_v26  ;;  %v451_v30 = vmul.u32 18, %v450_v27 }
  0xed   : > { %v481_v34 = vsub.s32 %v833_v37, %v480_v31 }
  0xee   : > { %v510_v32 = vsub.s32 %v830_v36, %v509_v29  ;;  %v452_v33 = vsub.s32 %v827_v35, %v451_v30  ;;  %v731_v35 = vmov 0.0  }
  0xef   : > { %vm514_vm5 = vcmp.ne.s32.totalorder %v481_v34, 0  ;;  %vm517_vm6 = vcmp.lt.s32.totalorder %v481_v34, 0  ;;  %v523_v3 = vadd.s32 18, %v481_v34 }
  0xf0   : > { %vm515_vm0 = vcmp.ne.s32.totalorder %v510_v32, 0  ;;  %vm518_vm1 = vcmp.lt.s32.totalorder %v510_v32, 0  ;;  %v524_v2 = vadd.s32 18, %v510_v32  ;;  %vm513_vm2 = vcmp.ne.s32.totalorder %v452_v33, 0  ;;  %vm520_vm8 = vmand %vm517_vm6, %vm514_vm5 }
  0xf1   : > { %vm516_vm3 = vcmp.lt.s32.totalorder %v452_v33, 0  ;;  %vm521_vm4 = vmand %vm518_vm1, %vm515_vm0  ;;  %v522_v38 = vadd.s32 18, %v452_v33  ;;  %v526_v36 = vsel %vm520_vm8, %v523_v3, %v481_v34 }
  0xf2   : > { %vm519_vm7 = vmand %vm516_vm3, %vm513_vm2  ;;  %v527_v39 = vsel %vm521_vm4, %v524_v2, %v510_v32  ;;  %vm529_vm11 = vcmp.lt.s32.totalorder %v526_v36, 16 }
  0xf3   : > { %vm530_vm9 = vcmp.lt.s32.totalorder %v527_v39, 16  ;;  %v525_v40 = vsel %vm519_vm7, %v522_v38, %v452_v33  ;;  %v656_v44 = vsel %vm529_vm11, 1.0, %v731_v35 }
  0xf4   : > { %v657_v42 = vsel %vm530_vm9, 1.0, %v731_v35  ;;  %vm528_vm10 = vcmp.lt.s32.totalorder %v525_v40, 16 }
  0xf5   : > { %v655_v43 = vsel %vm528_vm10, 1.0, %v731_v35 }
 0x15b   : > { %v419_v41 = vpop.f32.mrf.mxu2 }
 0x15c   : > { %v539_v37 = vmul.f32 %v657_v42, %v419_v41 }
 0x15e   : > { %v550_v49 = vmul.f32 %v539_v37, %v419_v41  ;;  %v542_v50 = vsel %vm541_vm12, %v539_v37, 0.0 }
 0x160   : > { %v379_v45 = vpop.f32.mrf.mxu0  ;;  %v399_v46 = vpop.f32.mrf.mxu1  ;;  %v552_v56 = vsel %vm541_vm12, %v550_v49, 0.0 }
 0x161   : > { %v537_v47 = vmul.f32 %v655_v43, %v379_v45  ;;  %v538_v48 = vmul.f32 %v656_v44, %v399_v46 }
 0x163   : > { %v548_v51 = vmul.f32 %v537_v47, %v379_v45  ;;  %v540_v52 = vadd.f32 %v538_v48, %v537_v47  ;;  %v549_v53 = vmul.f32 %v538_v48, %v399_v46 }
 0x165   : > { %v551_v54 = vadd.f32 %v549_v53, %v548_v51  ;;  %v543_v55 = vadd.f32 %v542_v50, %v540_v52 }
 0x167   : > { %544 = vadd.xlane.f32.xlu2 %v543_v55  ;;  %v553_v57 = vadd.f32 %v552_v56, %v551_v54 }
 0x169   : > { %554 = vadd.xlane.f32.xlu0 %v553_v57 }
 0x1da   : > { %v545_v58 = vpop.xlane.xlu2 %544 }
 0x1db   : > { %547 = vst.msk [vmem:[%s175_s4] sm:$0xff] %vm546_vm13, %v545_v58 }
 0x1dc   : > { %v555_v59 = vpop.xlane.xlu0 %554 }
 0x1dd   : > { %556 = vst.msk [vmem:[%s179_s7] sm:$0xff] %vm546_vm13, %v555_v59 }
 0x1de PF: > { %s14_s12 = sadd.s32 1, %s720_s12  }
 0x1df   : > { %p11_p4 = scmp.ge.s32.totalorder %s14_s12, 4  }
 0x1e1   :  { %13 = sbr.rel (!%p11_p4) target bundleno = 1 (0x1), region = 83 }

// kernel: cnn_block_forward.3
= control target key start
LH: loop header
LB: loop body
LE: loop exit
PB: predicated region body
PF: predicated region fallthrough
CT: control target
= control target key end

     0   :  { %s639_s15 = smov 0   ;;  %s749_s0 = inlined_call_operand.vmem [shape: f32[2,4,326], index: 0, kind: input, shape index: {}]   ;;  %s750_s1 = inlined_call_operand.vmem [shape: f32[8,36], index: 1, kind: input, shape index: {}]   ;;  %s751_s2 = inlined_call_operand.vmem [shape: f32[1,8,1], index: 2, kind: input, shape index: {}]   ;;  %s752_s3 = inlined_call_operand.vmem [shape: f32[1,8,1], index: 3, kind: input, shape index: {}]   ;;  %s753_s4 = inlined_call_operand.vmem [shape: f32[2,8,288], index: 4, kind: output, shape index: {}]  }
   0x1 LB: > { %s526_s16 = sadd.s32 4294967295, %s603_s15   ;;  %p530_p0 = scmp.ge.s32.totalorder %s603_s15, 1  ;;  %s603_s15 = sphi %s639_s15, %s14_s15  }
   0x2   : > { %p162_p1 = scmp.lt.s32.totalorder %s603_s15, 3 }
   0x4   : > { %p163_p2 = pnand %p530_p0, %p162_p1 }
   0x5   : > { %p188_p3 = scmp.lt.s32.totalorder (!%p163_p2), %s526_s16, 1  ;;  %s605_s21 = smov (!%p163_p2), 127  }
   0x6   : > { %166 = sbr.rel (%p163_p2) target bundleno = 368 (0x170), region = 36  ;;  %s606_s22 = smov (!%p163_p2), 110  }
   0x7   : > { %s607_s23 = smov (!%p163_p2), 126   ;;  %s608_s24 = smov (!%p163_p2), 109  }
   0x8   : > { %s609_s25 = smov (!%p163_p2), 108   ;;  %s610_s26 = smov (!%p163_p2), 92  }
   0x9   : > { %s611_s27 = smov (!%p163_p2), 91   ;;  %s612_s28 = smov (!%p163_p2), 90  }
   0xb   : > { %s755_s16 = smov (!%p188_p3, %s526_s16), 1  ;;  %v449_v44 = vld [vmem:[%s752_s3] sm:$0xff]  ;;  %v613_v47 = vmov 0   ;;  %vm316_vm0 = vcmask 752640   ;;  %vm335_vm1 = vcmask 744448   ;;  %vm353_vm2 = vcmask 736256  }
   0xc   : > { %s541_s17 = smul.u32 12, %s755_s16  ;;  %v440_v45 = vld [vmem:[%s751_s2] sm:$0xff]  ;;  %596 = vset.pattern.permute.xlu0 %v613_v47  ;;  %595 = vset.pattern.permute.xlu2 %v613_v47  ;;  %vm356_vm3 = vcmask 1043456   ;;  %vm279_vm4 = vcmask 891904   ;;  %vm298_vm5 = vcmask 883712   ;;  %vm370_vm6 = vcmask 293888  }
   0xd   : > { %vm242_vm7 = vcmask 1031168   ;;  %vm261_vm8 = vcmask 900096   ;;  %vm224_vm9 = vcmask 1039360   ;;  %s542_s9 = smul.u32 24, %s755_s16  ;;  %vm469_vm10 = vcmask 261120  }
   0xe   : > { %s192_s20 = scalar_lea.vmem %s749_s0, %s541_s17 }
   0xf   : > { %v198_v0 = vld [vmem:[%s192_s20] sm:$0xff]  ;;  %v199_v1 = vld [vmem:[%s192_s20 + $0x8] sm:$0xf]  ;;  %s197_s12 = scalar_lea.vmem %s753_s4, %s542_s9 }
  0x10   : > { %202 = vst [vmem:[#allocation1] ss:$2 sm:$0xff] %v198_v0 }
  0x11   : > { %204 = vst [vmem:[#allocation1 + $0x10] ss:$2 sm:$0xff] %v199_v1 }
  0x17   : > { %v653_v2 = vld.sshfl [vmem:[#allocation1] sm:$0xff pattern:$0x75316420]  ;;  %v655_v3 = vld.sshfl [vmem:[#allocation1 + $0x8] sm:$0xff pattern:$0x75316420] }
  0x18   : > { %v657_v4 = vld.sshfl [vmem:[#allocation1 + $0x10] sm:$0xff pattern:$0x75316420]  ;;  %212 = vst [vmem:[#allocation1 + $0x1] ss:$2 sm:$0xff] %v198_v0 }
  0x19   : > { %214 = vst [vmem:[#allocation1 + $0x11] ss:$2 sm:$0xff] %v199_v1 }
  0x1f   : > { %v215_v5 = vld.sshfl [vmem:[#allocation1] sm:$0xff pattern:$0x75316420]  ;;  %v659_v6 = vld.sshfl [vmem:[#allocation1 + $0x8] sm:$0xff pattern:$0x75316420] }
  0x20   : > { %v217_v7 = vld.sshfl [vmem:[#allocation1 + $0x10] sm:$0xff pattern:$0x75316420]  ;;  %230 = vst [vmem:[#allocation1] ss:$2 sm:$0xff] %v198_v0 }
  0x21   : > { %232 = vst [vmem:[#allocation1 + $0x10] ss:$2 sm:$0xff] %v199_v1  ;;  %v560_v11 = vpack.i.bf16 %v215_v5, %v217_v7 }
  0x23   : > { %561 = vrot.lane.b32.xlu2 %v560_v11, %s605_s21 }
  0x27   : > { %v233_v8 = vld.sshfl [vmem:[#allocation1] sm:$0xff pattern:$0x75316420]  ;;  %v234_v9 = vld.sshfl [vmem:[#allocation1 + $0x8] sm:$0xff pattern:$0x75316420] }
  0x28   : > { %v235_v10 = vld.sshfl [vmem:[#allocation1 + $0x10] sm:$0xff pattern:$0x75316420]  ;;  %249 = vst [vmem:[#allocation1 + $0x1] ss:$2 sm:$0xff] %v198_v0 }
  0x29   : > { %251 = vst [vmem:[#allocation1 + $0x11] ss:$2 sm:$0xff] %v199_v1  ;;  %v565_v16 = vpack.i.bf16 %v233_v8, %v235_v10 }
  0x2b   : > { %566 = vrot.lane.b32.xlu2 %v565_v16, %s607_s23 }
  0x2f   : > { %v252_v12 = vld.sshfl [vmem:[#allocation1] sm:$0xff pattern:$0x75316420]  ;;  %v253_v13 = vld.sshfl [vmem:[#allocation1 + $0x8] sm:$0xff pattern:$0x75316420] }
  0x30   : > { %v254_v14 = vld.sshfl [vmem:[#allocation1 + $0x10] sm:$0xff pattern:$0x75316420]  ;;  %267 = vst [vmem:[#allocation1] ss:$2 sm:$0xff] %v198_v0 }
  0x31   : > { %269 = vst [vmem:[#allocation1 + $0x10] ss:$2 sm:$0xff] %v199_v1  ;;  %v570_v15 = vpack.i.bf16 %v252_v12, %v254_v14 }
  0x33   : > { %571 = vrot.lane.b32.xlu0 %v570_v15, %s606_s22 }
  0x37   : > { %v271_v17 = vld.sshfl [vmem:[#allocation1 + $0x8] sm:$0xff pattern:$0x75316420]  ;;  %v270_v18 = vld.sshfl [vmem:[#allocation1] sm:$0xff pattern:$0x75316420] }
  0x38   : > { %v272_v19 = vld.sshfl [vmem:[#allocation1 + $0x10] sm:$0xff pattern:$0x75316420]  ;;  %286 = vst [vmem:[#allocation1 + $0x1] ss:$2 sm:$0xff] %v198_v0 }
  0x39   : > { %288 = vst [vmem:[#allocation1 + $0x11] ss:$2 sm:$0xff] %v199_v1  ;;  %v575_v20 = vpack.i.bf16 %v270_v18, %v272_v19 }
  0x3b   : > { %576 = vrot.lane.b32.xlu1 %v575_v20, %s608_s24 }
  0x3f   : > { %v289_v21 = vld.sshfl [vmem:[#allocation1] sm:$0xff pattern:$0x75316420]  ;;  %v290_v22 = vld.sshfl [vmem:[#allocation1 + $0x8] sm:$0xff pattern:$0x75316420] }
  0x40   : > { %v291_v23 = vld.sshfl [vmem:[#allocation1 + $0x10] sm:$0xff pattern:$0x75316420]  ;;  %304 = vst [vmem:[#allocation1] ss:$2 sm:$0xff] %v198_v0 }
  0x41   : > { %306 = vst [vmem:[#allocation1 + $0x10] ss:$2 sm:$0xff] %v199_v1  ;;  %v580_v24 = vpack.i.bf16 %v289_v21, %v291_v23 }
  0x43   : > { %581 = vrot.lane.b32.xlu2 %v580_v24, %s609_s25 }
  0x47   : > { %v307_v25 = vld.sshfl [vmem:[#allocation1] sm:$0xff pattern:$0x75316420]  ;;  %v308_v26 = vld.sshfl [vmem:[#allocation1 + $0x8] sm:$0xff pattern:$0x75316420] }
  0x48   : > { %v309_v27 = vld.sshfl [vmem:[#allocation1 + $0x10] sm:$0xff pattern:$0x75316420]  ;;  %323 = vst [vmem:[#allocation1 + $0x1] ss:$2 sm:$0xff] %v198_v0 }
  0x49   : > { %325 = vst [vmem:[#allocation1 + $0x11] ss:$2 sm:$0xff] %v199_v1  ;;  %v585_v28 = vpack.i.bf16 %v307_v25, %v309_v27 }
  0x4b   : > { %586 = vrot.lane.b32.xlu0 %v585_v28, %s610_s26 }
  0x4f   : > { %v326_v29 = vld.sshfl [vmem:[#allocation1] sm:$0xff pattern:$0x75316420]  ;;  %v327_v30 = vld.sshfl [vmem:[#allocation1 + $0x8] sm:$0xff pattern:$0x75316420] }
  0x50   : > { %v328_v31 = vld.sshfl [vmem:[#allocation1 + $0x10] sm:$0xff pattern:$0x75316420]  ;;  %341 = vst [vmem:[#allocation1] ss:$2 sm:$0xff] %v198_v0  ;;  %v369_v0 = vld [vmem:[%s750_s1] sm:$0xff] }
  0x51   : > { %343 = vst [vmem:[#allocation1 + $0x10] ss:$2 sm:$0xff] %v199_v1  ;;  %v590_v32 = vpack.i.bf16 %v326_v29, %v328_v31 }
  0x53   : > { %312 = vrot.lane.b32.xlu0 %v308_v26, %s610_s26  ;;  %591 = vrot.lane.b32.xlu1 %v590_v32, %s611_s27 }
  0x57   : > { %v345_v33 = vld.sshfl [vmem:[#allocation1 + $0x8] sm:$0xff pattern:$0x75316420]  ;;  %v344_v35 = vld.sshfl [vmem:[#allocation1] sm:$0xff pattern:$0x75316420] }
  0x58   : > { %v346_v34 = vld.sshfl [vmem:[#allocation1 + $0x10] sm:$0xff pattern:$0x75316420]  ;;  %349 = vrot.lane.b32.xlu2 %v345_v33, %s612_s28 }
  0x5b   : > { %351 = vrot.lane.b32.xlu0 %v346_v34, %s612_s28  ;;  %331 = vrot.lane.b32.xlu1 %v327_v30, %s611_s27 }
  0x60   : > { %238 = vrot.lane.b32.xlu2 %v234_v9, %s607_s23 }
  0x63   : > { %275 = vrot.lane.b32.xlu0 %v271_v17, %s608_s24  ;;  %294 = vrot.lane.b32.xlu1 %v290_v22, %s609_s25 }
  0x68   : > { %443 = vperm.xlu2 %595, %v440_v45  }
  0x6b   : > { %257 = vrot.lane.b32.xlu0 %v253_v13, %s606_s22  ;;  %347 = vrot.lane.b32.xlu1 %v344_v35, %s612_s28 }
  0x73   : > { %220 = vrot.lane.b32.xlu1 %v659_v6, %s605_s21  ;;  %452 = vperm.xlu0 %596, %v449_v44  }
  0x7d   : > { %v670_v36 = vpop.permute.xlu2 %561 }
  0x7e   : > { %v563_v61 = vunpack.i.l.bf16 %v670_v36  ;;  %v564_v30 = vunpack.i.h.bf16 %v670_v36 }
  0x80   : > { %v359_v6 = vsel %vm356_vm3, %v657_v4, %v563_v61 }
  0x85   : > { %v674_v38 = vpop.permute.xlu2 %566 }
  0x86   : > { %v568_v57 = vunpack.i.l.bf16 %v674_v38  ;;  %v569_v4 = vunpack.i.h.bf16 %v674_v38 }
  0x9d   : > { %v680_v41 = vpop.permute.xlu2 %581 }
  0x9e   : > { %v583_v51 = vunpack.i.l.bf16 %v680_v41  ;;  %v584_v10 = vunpack.i.h.bf16 %v680_v41 }
  0xa5   : > { %v672_v37 = vpop.permute.xlu0 %571 }
  0xa6   : > { %v573_v58 = vunpack.i.l.bf16 %v672_v37  ;;  %v574_v18 = vunpack.i.h.bf16 %v672_v37 }
  0xa8   : > { %v362_v63 = vsel %vm356_vm3, %v568_v57, %v573_v58 }
  0xad   : > { %v676_v39 = vpop.permute.xlu1 %576 }
  0xae   : > { %v578_v50 = vunpack.i.l.bf16 %v676_v39  ;;  %v579_v14 = vunpack.i.h.bf16 %v676_v39 }
  0xb0   : > { %v365_v62 = vsel %vm356_vm3, %v578_v50, %v583_v51 }
  0xb2   : > { %v350_v49 = vpop.permute.xlu2 %349 }
  0xba   : > { %v239_v13 = vpop.permute.xlu2 %238 }
  0xbb   : > { %v244_v19 = vsel %vm242_vm7, %v239_v13, %v568_v57  ;;  %v243_v29 = vsel %vm242_vm7, %v569_v4, %v239_v13 }
  0xbd   : > { %v678_v40 = vpop.permute.xlu0 %586 }
  0xbe   : > { %v588_v46 = vunpack.i.l.bf16 %v678_v40  ;;  %v589_v11 = vunpack.i.h.bf16 %v678_v40 }
  0xc2   : > { %v444_v36 = vpop.permute.xlu2 %443 }
  0xc5   : > { %v682_v42 = vpop.permute.xlu0 %312  ;;  %v592_v43 = vpop.permute.xlu1 %591 }
  0xc6   : > { %v593_v48 = vunpack.i.l.bf16 %v592_v43  ;;  %v318_v54 = vsel %vm316_vm0, %v682_v42, %v588_v46  ;;  %v594_v12 = vunpack.i.h.bf16 %v592_v43  ;;  %v317_v22 = vsel %vm316_vm0, %v589_v11, %v682_v42 }
  0xc8   : > { %v368_v59 = vsel %vm356_vm3, %v588_v46, %v593_v48 }
  0xcd   : > { %v352_v52 = vpop.permute.xlu0 %351  ;;  %v332_v53 = vpop.permute.xlu1 %331 }
  0xce   : > { %v337_v55 = vsel %vm335_vm1, %v332_v53, %v593_v48  ;;  %537 = vmatpush.msk.msra.mxu2 %vm356_vm3, %v352_v52  ;;  %v355_v56 = vsel %vm353_vm2, %v350_v49, %v352_v52  ;;  %v336_v15 = vsel %vm335_vm1, %v594_v12, %v332_v53 }
  0xcf   : > { %535 = vmatpush.msk.msra.mxu1 %vm356_vm3, %v355_v56  ;;  %v367_v60 = vsel %vm356_vm3, %v318_v54, %v337_v55  ;;  %v366_v26 = vsel %vm356_vm3, %v317_v22, %v336_v15 }
  0xd0   : > { %432 = vmatpush.msra.mxu2 %v368_v59 }
  0xd1   : > { %412 = vmatpush.msra.mxu1 %v367_v60 }
  0xd2   : > { %433 = vmatpush.msra.mxu2 %v365_v62 }
  0xd4   : > { %434 = vmatpush.msra.mxu2 %v362_v63 }
  0xd5   : > { %v276_v1 = vpop.permute.xlu0 %275  ;;  %v295_v5 = vpop.permute.xlu1 %294 }
  0xd6   : > { %v281_v7 = vsel %vm279_vm4, %v276_v1, %v578_v50  ;;  %v300_v8 = vsel %vm298_vm5, %v295_v5, %v583_v51  ;;  %435 = vmatpush.msra.mxu2 %v359_v6  ;;  %v280_v23 = vsel %vm279_vm4, %v579_v14, %v276_v1  ;;  %v299_v24 = vsel %vm298_vm5, %v584_v10, %v295_v5 }
  0xd7   : > { %v364_v9 = vsel %vm356_vm3, %v281_v7, %v300_v8  ;;  %538 = vmatmul.msk.f32.vlgmr.msra.gmra.mxu2 %vm370_vm6, %v369_v0  ;;  %v363_v28 = vsel %vm356_vm3, %v280_v23, %v299_v24 }
  0xd8   : > { %413 = vmatpush.msra.mxu1 %v364_v9 }
  0xdd   : > { %v258_v16 = vpop.permute.xlu0 %257  ;;  %v348_v17 = vpop.permute.xlu1 %347 }
  0xde   : > { %v263_v20 = vsel %vm261_vm8, %v258_v16, %v573_v58  ;;  %v354_v21 = vsel %vm353_vm2, %v348_v17, %v350_v49  ;;  %v262_v27 = vsel %vm261_vm8, %v574_v18, %v258_v16 }
  0xdf   : > { %533 = vmatpush.msk.msra.mxu0 %vm356_vm3, %v354_v21  ;;  %v361_v25 = vsel %vm356_vm3, %v244_v19, %v263_v20  ;;  %v360_v31 = vsel %vm356_vm3, %v243_v29, %v262_v27 }
  0xe0   : > { %414 = vmatpush.msra.mxu1 %v361_v25 }
  0xe1   : > { %392 = vmatpush.msra.mxu0 %v366_v26 }
  0xe3   : > { %393 = vmatpush.msra.mxu0 %v363_v28 }
  0xe5   : > { %394 = vmatpush.msra.mxu0 %v360_v31  ;;  %v221_v32 = vpop.permute.xlu1 %220  ;;  %v453_v39 = vpop.permute.xlu0 %452 }
  0xe6   : > { %v225_v33 = vsel %vm224_vm9, %v564_v30, %v221_v32  ;;  %v226_v34 = vsel %vm224_vm9, %v221_v32, %v563_v61 }
  0xe7   : > { %v357_v35 = vsel %vm356_vm3, %v653_v2, %v225_v33  ;;  %v358_v37 = vsel %vm356_vm3, %v655_v3, %v226_v34 }
  0xe8   : > { %395 = vmatpush.msra.mxu0 %v357_v35  ;;  %415 = vmatpush.msra.mxu1 %v358_v37 }
  0xe9   : > { %534 = vmatmul.msk.f32.vlgmr.msra.gmra.mxu0 %vm370_vm6, %v369_v0  ;;  %536 = vmatmul.msk.f32.vlgmr.msra.gmra.mxu1 %vm370_vm6, %v369_v0 }
 0x15a   : > { %v437_v38 = vpop.f32.mrf.mxu2 }
 0x15b   : > { %v448_v40 = vmul.f32 %v444_v36, %v437_v38 }
 0x15d   : > { %v457_v41 = vadd.f32 %v453_v39, %v448_v40 }
 0x15f   : > { %vm460_vm11 = vcmp.ge.f32.partialorder %v457_v41, 0.0  ;;  %v463_v2 = vmul.f32 0.1, %v457_v41 }
 0x161   : > { %v466_v3 = vsel %vm460_vm11, %v457_v41, %v463_v2 }
 0x162   : > { %470 = vst.msk [vmem:[%s197_s12 + $0x10] sm:$0xff] %vm469_vm10, %v466_v3 }
 0x166   : > { %v397_v42 = vpop.f32.mrf.mxu0  ;;  %v417_v43 = vpop.f32.mrf.mxu1 }
 0x167   : > { %v446_v44 = vmul.f32 %v444_v36, %v397_v42  ;;  %v447_v45 = vmul.f32 %v444_v36, %v417_v43 }
 0x169   : > { %v455_v46 = vadd.f32 %v453_v39, %v446_v44  ;;  %v456_v47 = vadd.f32 %v453_v39, %v447_v45 }
 0x16b   : > { %vm458_vm12 = vcmp.ge.f32.partialorder %v455_v46, 0.0  ;;  %v461_v48 = vmul.f32 0.1, %v455_v46  ;;  %vm459_vm13 = vcmp.ge.f32.partialorder %v456_v47, 0.0  ;;  %v462_v49 = vmul.f32 0.1, %v456_v47 }
 0x16d   : > { %v464_v50 = vsel %vm458_vm12, %v455_v46, %v461_v48  ;;  %v465_v51 = vsel %vm459_vm13, %v456_v47, %v462_v49 }
 0x16e   : > { %467 = vst [vmem:[%s197_s12] sm:$0xff] %v464_v50 }
 0x16f   : > { %468 = vst [vmem:[%s197_s12 + $0x8] sm:$0xff] %v465_v51 }
 0x170 PF: > { %s14_s15 = sadd.s32 1, %s603_s15  }
 0x171   : > { %p11_p4 = scmp.ge.s32.totalorder %s14_s15, 4  }
 0x173   :  { %13 = sbr.rel (!%p11_p4) target bundleno = 1 (0x1), region = 79 }

</bundles_post_ra>
